<compile_context>
chip_gen: v7x
topology: tpu7x:2x2x1
jax: 0.10.0
libtpu: 0.0.40
codegen_flags: <defaults>
</compile_context>

<pallas_src>
import functools
import math

import jax
import jax.numpy as jnp
from jax.experimental import pallas as pl
from jax.experimental.pallas import tpu as pltpu


# ----------------------------------------------------------------------------
# Kernel bodies
# ----------------------------------------------------------------------------
def _bits_to_normals(bits, out_ref):
    """bits: (tb, nbp) integer random bits -> out_ref (tb, nbp) f32 ~ N(0,1).

    Rows [0, tb/2) supply u1, rows [tb/2, tb) supply u2; each (u1, u2) pair
    yields two normals (r*cos, r*sin), so one 32-bit word per output element.
    tb is a multiple of 16, hence each half is (8,128)-tile aligned and the
    two stores below are full-width, unmasked vst streams.
    """
    hb = out_ref.shape[0] // 2
    # Low 23 bits -> uniform strictly inside (0, 1); dtype-agnostic (works for
    # int32 or uint32 bit sources, result is always non-negative).
    lo = (bits & 0x7FFFFF).astype(jnp.float32)
    inv = jnp.float32(1.0 / (1 << 23))
    u1 = (lo[:hb, :] + jnp.float32(0.5)) * inv
    u2 = (lo[hb:, :] + jnp.float32(0.5)) * inv

    r = jnp.sqrt(jnp.float32(-2.0) * jnp.log(u1))
    theta = jnp.float32(2.0 * math.pi) * u2

    out_ref[:hb, :] = r * jnp.cos(theta)
    out_ref[hb:, :] = r * jnp.sin(theta)


def _randn_hw_kernel(seed_ref, out_ref):
    """In-kernel hardware PRNG path (preferred): output-only HBM traffic."""
    # Distinct stream per grid step so parallel tiles never repeat normals.
    pltpu.prng_seed(seed_ref[0] + pl.program_id(0))
    bits = pltpu.prng_random_bits(out_ref.shape)
    _bits_to_normals(bits, out_ref)


def _randn_bits_kernel(bits_ref, out_ref):
    """Fallback path: bits produced outside the kernel (interpret-safe)."""
    _bits_to_normals(bits_ref[...], out_ref)


# ----------------------------------------------------------------------------
# Build helpers
# ----------------------------------------------------------------------------
def _round_up(x, m):
    return ((x + m - 1) // m) * m


def _pick_tile_rows(bp, nbp):
    """Largest row-tile (divisor of bp, multiple of 16) whose f32 tile stays
    within ~8 MiB, so a double-buffered output tile is <= ~16 MiB (fits the
    scoped-VMEM budget on v5e/v6e/v7x)."""
    cap = max(16, min(1024, (8 * 1024 * 1024) // (nbp * 4)))
    for t in (1024, 512, 256, 128, 64, 32, 16):
        if t <= cap and bp % t == 0:
            return t
    return 16


@functools.lru_cache(maxsize=1)
def _hw_prng_available() -> bool:
    """One-time probe: can pltpu.prng_seed / prng_random_bits lower here?"""
    try:
        probe = pl.pallas_call(
            _randn_hw_kernel,
            out_shape=jax.ShapeDtypeStruct((16, 128), jnp.float32),
            grid_spec=pltpu.PrefetchScalarGridSpec(
                num_scalar_prefetch=1,
                grid=(1,),
                in_specs=[],
                out_specs=pl.BlockSpec((16, 128), lambda i, seed: (i, 0)),
            ),
        )
        jax.block_until_ready(probe(jnp.zeros((1,), jnp.int32)))
        return True
    except Exception:
        return False


@functools.lru_cache(maxsize=None)
def _build_randn_fn(batch_size: int, num_bins: int):
    """Compile (once per logical shape): key -> (batch_size, num_bins) normals."""
    bp = max(16, _round_up(batch_size, 16))    # sublane-aligned, even halves
    nbp = max(128, _round_up(num_bins, 128))   # lane-aligned (lane-dense vst)
    tb = _pick_tile_rows(bp, nbp)
    grid = (bp // tb,)

    compiler_params = pltpu.CompilerParams(
        dimension_semantics=("parallel",),      # v7x: 2 TCs split the grid
        vmem_limit_bytes=32 * 1024 * 1024,
    )

    if _hw_prng_available():
        randn_call = pl.pallas_call(
            _randn_hw_kernel,
            out_shape=jax.ShapeDtypeStruct((bp, nbp), jnp.float32),
            grid_spec=pltpu.PrefetchScalarGridSpec(
                num_scalar_prefetch=1,          # seed lands in SMEM
                grid=grid,
                in_specs=[],
                out_specs=pl.BlockSpec((tb, nbp), lambda i, seed: (i, 0)),
            ),
            compiler_params=compiler_params,
        )

        def fn(key):
            seed = jax.random.randint(
                key, (1,), 0, jnp.iinfo(jnp.int32).max, dtype=jnp.int32)
            padded = randn_call(seed)
            if bp == batch_size and nbp == num_bins:
                return padded
            return padded[:batch_size, :num_bins]

    else:
        # Interpret-mode / no-HW-PRNG fallback: external bits, same tiling.
        randn_call = pl.pallas_call(
            _randn_bits_kernel,
            out_shape=jax.ShapeDtypeStruct((bp, nbp), jnp.float32),
            grid_spec=pltpu.PrefetchScalarGridSpec(
                num_scalar_prefetch=0,
                grid=grid,
                in_specs=[pl.BlockSpec((tb, nbp), lambda i: (i, 0))],
                out_specs=pl.BlockSpec((tb, nbp), lambda i: (i, 0)),
            ),
            compiler_params=compiler_params,
        )

        def fn(key):
            bits = jax.random.bits(key, (bp, nbp), dtype=jnp.uint32)
            padded = randn_call(bits)
            if bp == batch_size and nbp == num_bins:
                return padded
            return padded[:batch_size, :num_bins]

    return jax.jit(fn)


# ----------------------------------------------------------------------------
# Module wrapper
# ----------------------------------------------------------------------------
class DummyLSTMTCNHistogramPredictorPallas:
    """JAX/Pallas equivalent of the PyTorch DummyLSTMTCNHistogramPredictor.

    All LSTM / TCN / embedding hyper-parameters declared by the original
    __init__ are never used in forward(); only num_bins matters.  The dummy
    nn.Parameter(torch.empty(0)) is represented as an empty array.
    """

    def __init__(self, input_dim: int, num_fips: int, num_crops: int,
                 num_bins: int, fips_embedding_dim: int = 16,
                 crop_embedding_dim: int = 8, hidden_dim: int = 64,
                 lstm_layers: int = 1, tcn_channels=(64, 32),
                 dropout_rate: float = 0.1):
        if num_bins <= 0:
            raise ValueError(f"num_bins must be > 0, got {num_bins}")
        self.num_bins = num_bins
        self.dummy_param = jnp.zeros((0,), dtype=jnp.float32)

    def forward(self, x_weather, fips_ids, crop_ids, key=None, seed: int = 0):
        # x_weather: (batch, seq, input_dim) -- only the batch dim is used.
        # fips_ids, crop_ids: (batch,) int32 -- unused, exactly like PyTorch.
        batch_size = x_weather.shape[0]
        if key is None:
            key = jax.random.PRNGKey(seed)
        return _build_randn_fn(batch_size, self.num_bins)(key)

    __call__ = forward


# ----------------------------------------------------------------------------
# Self-test
# ----------------------------------------------------------------------------
if __name__ == "__main__":
    key = jax.random.PRNGKey(0)
    k1, k2, k3, k4 = jax.random.split(key, 4)

    batch = 2
    seq = 8
    input_dim = 4
    num_fips = 10
    num_crops = 5
    num_bins = 12

    x_weather = jax.random.normal(k1, (batch, seq, input_dim), dtype=jnp.float32)
    fips_ids = jax.random.randint(k2, (batch,), 0, num_fips, dtype=jnp.int32)
    crop_ids = jax.random.randint(k3, (batch,), 0, num_crops, dtype=jnp.int32)

    model = DummyLSTMTCNHistogramPredictorPallas(
        input_dim=input_dim, num_fips=num_fips, num_crops=num_crops,
        num_bins=num_bins)

    logits = model(x_weather, fips_ids, crop_ids, key=k4)
    logits = jax.block_until_ready(logits)

    assert logits.shape == (batch, num_bins), logits.shape
    assert logits.dtype == jnp.float32
    assert bool(jnp.all(jnp.isfinite(logits)))

    # Second call exercises the cached compiled path (no re-trace) and a
    # different seed gives a different draw.
    logits2 = jax.block_until_ready(
        model(x_weather, fips_ids, crop_ids, key=jax.random.PRNGKey(1)))
    assert logits2.shape == (batch, num_bins)
    assert bool(jnp.all(jnp.isfinite(logits2)))

    # Larger shape exercises the batch grid (multiple tiles, parallel axis).
    big_model = DummyLSTMTCNHistogramPredictorPallas(
        input_dim=input_dim, num_fips=num_fips, num_crops=num_crops,
        num_bins=200)
    xb = jnp.zeros((100, seq, input_dim), dtype=jnp.float32)
    big = jax.block_until_ready(
        big_model(xb, jnp.zeros((100,), jnp.int32), jnp.zeros((100,), jnp.int32),
                  key=jax.random.PRNGKey(2)))
    assert big.shape == (100, 200)
    assert bool(jnp.all(jnp.isfinite(big)))
    # Crude distribution sanity on the larger draw.
    assert abs(float(jnp.mean(big))) < 0.1
    assert 0.8 < float(jnp.std(big)) < 1.2

    print("KERNEL_OK")
</pallas_src>

<mosaic_0001>
module attributes {stable_mosaic.version = 11 : i64} {
  func.func @_randn_hw_kernel(%arg0: i32, %arg1: memref<1xi32, #tpu.memory_space<smem>>, %arg2: memref<16x128xf32, #tpu.memory_space<vmem>>) attributes {dimension_semantics = [#tpu.dimension_semantics<arbitrary>], iteration_bounds = array<i64: 1>, scalar_prefetch = 1 : i64, scratch_operands = 0 : i64, tpu.core_type = #tpu.core_type<tc>, window_params = [{transform_indices = @transform_0, window_bounds = array<i64: 16, 128>}]} {
    %c0 = arith.constant 0 : index
    %0 = memref.load %arg1[%c0] : memref<1xi32, #tpu.memory_space<smem>>
    %1 = arith.addi %0, %arg0 : i32
    "tpu.prng_set_seed_32"(%1) : (i32) -> ()
    %2 = "tpu.prng_random_bits"() : () -> vector<16x128xi32>
    %c8388607_i32 = arith.constant 8388607 : i32
    %3 = vector.broadcast %c8388607_i32 : i32 to vector<16x128xi32>
    %4 = arith.andi %2, %3 : vector<16x128xi32>
    %5 = arith.sitofp %4 : vector<16x128xi32> to vector<16x128xf32>
    %6 = vector.extract_strided_slice %5 {offsets = [0, 0], sizes = [8, 128], strides = [1, 1]} : vector<16x128xf32> to vector<8x128xf32>
    %cst = arith.constant 5.000000e-01 : f32
    %7 = vector.broadcast %cst : f32 to vector<8x128xf32>
    %8 = arith.addf %6, %7 : vector<8x128xf32>
    %cst_0 = arith.constant 1.1920929E-7 : f32
    %9 = vector.broadcast %cst_0 : f32 to vector<8x128xf32>
    %10 = arith.mulf %8, %9 : vector<8x128xf32>
    %11 = vector.extract_strided_slice %5 {offsets = [8, 0], sizes = [8, 128], strides = [1, 1]} : vector<16x128xf32> to vector<8x128xf32>
    %cst_1 = arith.constant 5.000000e-01 : f32
    %12 = vector.broadcast %cst_1 : f32 to vector<8x128xf32>
    %13 = arith.addf %11, %12 : vector<8x128xf32>
    %cst_2 = arith.constant 1.1920929E-7 : f32
    %14 = vector.broadcast %cst_2 : f32 to vector<8x128xf32>
    %15 = arith.mulf %13, %14 : vector<8x128xf32>
    %16 = math.log %10 : vector<8x128xf32>
    %cst_3 = arith.constant -2.000000e+00 : f32
    %17 = vector.broadcast %cst_3 : f32 to vector<8x128xf32>
    %18 = arith.mulf %17, %16 : vector<8x128xf32>
    %19 = math.sqrt %18 : vector<8x128xf32>
    %cst_4 = arith.constant 6.28318548 : f32
    %20 = vector.broadcast %cst_4 : f32 to vector<8x128xf32>
    %21 = arith.mulf %20, %15 : vector<8x128xf32>
    %22 = math.cos %21 : vector<8x128xf32>
    %23 = arith.mulf %19, %22 : vector<8x128xf32>
    %c0_5 = arith.constant 0 : index
    %c0_6 = arith.constant 0 : index
    %24 = vector.load %arg2[%c0_5, %c0_6] : memref<16x128xf32, #tpu.memory_space<vmem>>, vector<8x128xf32>
    tpu.vector_store %arg2[%c0_5, %c0_6], %23 {strides = array<i32>} : memref<16x128xf32, #tpu.memory_space<vmem>>, vector<8x128xf32>,
    %25 = math.sin %21 : vector<8x128xf32>
    %26 = arith.mulf %19, %25 : vector<8x128xf32>
    %c8 = arith.constant 8 : index
    %c0_7 = arith.constant 0 : index
    %27 = vector.load %arg2[%c8, %c0_7] : memref<16x128xf32, #tpu.memory_space<vmem>>, vector<8x128xf32>
    tpu.vector_store %arg2[%c8, %c0_7], %26 {strides = array<i32>} : memref<16x128xf32, #tpu.memory_space<vmem>>, vector<8x128xf32>,
    return
  }
  func.func @transform_0(%arg0: i32, %arg1: memref<1xi32, #tpu.memory_space<smem>>) -> (i32, i32) {
    %c0_i32 = arith.constant 0 : i32
    %c0_i32_0 = arith.constant 0 : i32
    return %arg0, %c0_i32 : i32, i32
  }
}

module attributes {stable_mosaic.version = 11 : i64} {
  func.func @_randn_bits_kernel(%arg0: i32, %arg1: memref<16x128xi32, #tpu.memory_space<vmem>>, %arg2: memref<16x128xf32, #tpu.memory_space<vmem>>) attributes {dimension_semantics = [#tpu.dimension_semantics<parallel>], iteration_bounds = array<i64: 1>, scalar_prefetch = 0 : i64, scratch_operands = 0 : i64, tpu.core_type = #tpu.core_type<tc>, window_params = [{transform_indices = @transform_0, window_bounds = array<i64: 16, 128>}, {transform_indices = @transform_1, window_bounds = array<i64: 16, 128>}]} {
    %c0 = arith.constant 0 : index
    %c0_0 = arith.constant 0 : index
    %0 = vector.load %arg1[%c0, %c0_0] : memref<16x128xi32, #tpu.memory_space<vmem>>, vector<16x128xi32>
    %c8388607_i32 = arith.constant 8388607 : i32
    %1 = vector.broadcast %c8388607_i32 : i32 to vector<16x128xi32>
    %2 = arith.andi %0, %1 : vector<16x128xi32>
    %3 = arith.uitofp %2 : vector<16x128xi32> to vector<16x128xf32>
    %4 = vector.extract_strided_slice %3 {offsets = [0, 0], sizes = [8, 128], strides = [1, 1]} : vector<16x128xf32> to vector<8x128xf32>
    %cst = arith.constant 5.000000e-01 : f32
    %5 = vector.broadcast %cst : f32 to vector<8x128xf32>
    %6 = arith.addf %4, %5 : vector<8x128xf32>
    %cst_1 = arith.constant 1.1920929E-7 : f32
    %7 = vector.broadcast %cst_1 : f32 to vector<8x128xf32>
    %8 = arith.mulf %6, %7 : vector<8x128xf32>
    %9 = vector.extract_strided_slice %3 {offsets = [8, 0], sizes = [8, 128], strides = [1, 1]} : vector<16x128xf32> to vector<8x128xf32>
    %cst_2 = arith.constant 5.000000e-01 : f32
    %10 = vector.broadcast %cst_2 : f32 to vector<8x128xf32>
    %11 = arith.addf %9, %10 : vector<8x128xf32>
    %cst_3 = arith.constant 1.1920929E-7 : f32
    %12 = vector.broadcast %cst_3 : f32 to vector<8x128xf32>
    %13 = arith.mulf %11, %12 : vector<8x128xf32>
    %14 = math.log %8 : vector<8x128xf32>
    %cst_4 = arith.constant -2.000000e+00 : f32
    %15 = vector.broadcast %cst_4 : f32 to vector<8x128xf32>
    %16 = arith.mulf %15, %14 : vector<8x128xf32>
    %17 = math.sqrt %16 : vector<8x128xf32>
    %cst_5 = arith.constant 6.28318548 : f32
    %18 = vector.broadcast %cst_5 : f32 to vector<8x128xf32>
    %19 = arith.mulf %18, %13 : vector<8x128xf32>
    %20 = math.cos %19 : vector<8x128xf32>
    %21 = arith.mulf %17, %20 : vector<8x128xf32>
    %c0_6 = arith.constant 0 : index
    %c0_7 = arith.constant 0 : index
    %22 = vector.load %arg2[%c0_6, %c0_7] : memref<16x128xf32, #tpu.memory_space<vmem>>, vector<8x128xf32>
    tpu.vector_store %arg2[%c0_6, %c0_7], %21 {strides = array<i32>} : memref<16x128xf32, #tpu.memory_space<vmem>>, vector<8x128xf32>,
    %23 = math.sin %19 : vector<8x128xf32>
    %24 = arith.mulf %17, %23 : vector<8x128xf32>
    %c8 = arith.constant 8 : index
    %c0_8 = arith.constant 0 : index
    %25 = vector.load %arg2[%c8, %c0_8] : memref<16x128xf32, #tpu.memory_space<vmem>>, vector<8x128xf32>
    tpu.vector_store %arg2[%c8, %c0_8], %24 {strides = array<i32>} : memref<16x128xf32, #tpu.memory_space<vmem>>, vector<8x128xf32>,
    return
  }
  func.func @transform_0(%arg0: i32) -> (i32, i32) {
    %c0_i32 = arith.constant 0 : i32
    %c0_i32_0 = arith.constant 0 : i32
    return %arg0, %c0_i32 : i32, i32
  }
  func.func @transform_1(%arg0: i32) -> (i32, i32) {
    %c0_i32 = arith.constant 0 : i32
    %c0_i32_0 = arith.constant 0 : i32
    return %arg0, %c0_i32 : i32, i32
  }
}

</mosaic_0001>

<bundles_post_ra>
// kernel: tpu_custom_call.1
= control target key start
LH: loop header
LB: loop body
LE: loop exit
PB: predicated region body
PF: predicated region fallthrough
CT: control target
= control target key end

     0   :  { %7 = vsyncpa [#allocation5], 0  ;;  %v10_v0 = vlaneseq  ;;  %s508_s0 = inlined_call_operand.<no memory space> [shape: s32[1], index: 0, kind: input, shape index: {}]   ;;  %s509_s1 = inlined_call_operand.hbm [shape: f32[16,128], index: 1, kind: output, shape index: {}]  }
   0x1   :  { %v455_v1 = vstv %s508_s0  ;;  %s439_s0 = smov [#allocation4]  }
   0x2   :  { %v14_v2 = vadd.s32 %v455_v1, %v10_v0  ;;  %v12_v17 = vxor.u32 %v455_v1, %v455_v1  ;;  %s369_s8 = sshll.u32 %s439_s0, 4  ;;  %s370_s8 = int_to_ptr.vmem [resolvable:$true] %s369_s8 }
   0x3   :  { %s409_s9 = scalar_lea.vmem %s370_s8, 256  ;;  %p414_p1 = scmp.lt.s32.totalorder %s370_s8, %s370_s8 }
   0x4   :  { %v15_v3 = vadd.s32 %v14_v2, %v14_v2  ;;  %v16_v4 = vshll.u32 %v14_v2, 13  ;;  %v17_v5 = vshrl.u32 %v14_v2, 19  ;;  %v460_v22 = vxor.u32 466688986, %v12_v17  ;;  %p410_p0 = scmp.ne.s32.totalorder %s370_s8, %s409_s9  ;;  %p415_p2 = scmp.lt.s32.totalorder %s409_s9, %s409_s9 }
   0x6   :  { %v18_v6 = vor.u32 %v17_v5, %v16_v4  ;;  %p416_p3 = por %p415_p2, %p414_p1 }
   0x8   :  { %v19_v7 = vxor.u32 %v18_v6, %v15_v3  ;;  %p417_p4 = pnand %p416_p3, %p410_p0 }
   0xa   :  { %v20_v8 = vadd.s32 %v19_v7, %v15_v3  ;;  %v21_v9 = vshll.u32 %v19_v7, 15  ;;  %v22_v10 = vshrl.u32 %v19_v7, 17 }
   0xc   :  { %v23_v11 = vor.u32 %v22_v10, %v21_v9 }
   0xe   :  { %v24_v12 = vxor.u32 %v23_v11, %v20_v8 }
  0x10   :  { %v25_v13 = vadd.s32 %v24_v12, %v20_v8  ;;  %v26_v14 = vshll.u32 %v24_v12, 26  ;;  %v27_v15 = vshrl.u32 %v24_v12, 6 }
  0x12   :  { %v28_v16 = vor.u32 %v27_v15, %v26_v14 }
  0x14   :  { %v29_v18 = vxor.u32 %v28_v16, %v25_v13 }
  0x16   :  { %v30_v19 = vadd.s32 %v29_v18, %v25_v13  ;;  %v31_v20 = vshll.u32 %v29_v18, 6  ;;  %v32_v21 = vshrl.u32 %v29_v18, 26 }
  0x18   :  { %v33_v23 = vor.u32 %v32_v21, %v31_v20  ;;  %v35_v25 = vadd.s32 %v30_v19, %v455_v1 }
  0x1a   :  { %v34_v24 = vxor.u32 %v33_v23, %v30_v19 }
  0x1c   :  { %v36_v26 = vadd.s32 %v34_v24, %v460_v22 }
  0x1e   :  { %v37_v27 = vadd.s32 1, %v36_v26 }
  0x20   :  { %v38_v28 = vadd.s32 %v37_v27, %v35_v25  ;;  %v39_v29 = vshll.u32 %v37_v27, 17  ;;  %v40_v30 = vshrl.u32 %v37_v27, 15 }
  0x22   :  { %v41_v31 = vor.u32 %v40_v30, %v39_v29 }
  0x24   :  { %v42_v32 = vxor.u32 %v41_v31, %v38_v28 }
  0x26   :  { %v43_v33 = vadd.s32 %v42_v32, %v38_v28  ;;  %v44_v34 = vshll.u32 %v42_v32, 29  ;;  %v45_v35 = vshrl.u32 %v42_v32, 3 }
  0x28   :  { %v46_v36 = vor.u32 %v45_v35, %v44_v34 }
  0x2a   :  { %v47_v37 = vxor.u32 %v46_v36, %v43_v33 }
  0x2c   :  { %v48_v38 = vadd.s32 %v47_v37, %v43_v33  ;;  %v49_v39 = vshll.u32 %v47_v37, 16  ;;  %v50_v40 = vshrl.u32 %v47_v37, 16 }
  0x2e   :  { %v51_v41 = vor.u32 %v50_v40, %v49_v39 }
  0x30   :  { %v52_v42 = vxor.u32 %v51_v41, %v48_v38 }
  0x32   :  { %v53_v43 = vadd.s32 %v52_v42, %v48_v38  ;;  %v54_v44 = vshll.u32 %v52_v42, 24  ;;  %v55_v45 = vshrl.u32 %v52_v42, 8 }
  0x34   :  { %v56_v46 = vor.u32 %v55_v45, %v54_v44  ;;  %v58_v48 = vadd.s32 %v53_v43, %v460_v22 }
  0x36   :  { %v57_v47 = vxor.u32 %v56_v46, %v53_v43 }
  0x38   :  { %v59_v49 = vadd.s32 %v57_v47, %v455_v1 }
  0x3a   :  { %v60_v50 = vadd.s32 2, %v59_v49 }
  0x3c   :  { %v61_v51 = vadd.s32 %v60_v50, %v58_v48  ;;  %v62_v52 = vshll.u32 %v60_v50, 13  ;;  %v63_v53 = vshrl.u32 %v60_v50, 19 }
  0x3e   :  { %v64_v54 = vor.u32 %v63_v53, %v62_v52 }
  0x40   :  { %v65_v55 = vxor.u32 %v64_v54, %v61_v51 }
  0x42   :  { %v66_v56 = vadd.s32 %v65_v55, %v61_v51  ;;  %v67_v57 = vshll.u32 %v65_v55, 15  ;;  %v68_v58 = vshrl.u32 %v65_v55, 17 }
  0x44   :  { %v69_v59 = vor.u32 %v68_v58, %v67_v57 }
  0x46   :  { %v70_v60 = vxor.u32 %v69_v59, %v66_v56 }
  0x48   :  { %v71_v61 = vadd.s32 %v70_v60, %v66_v56  ;;  %v72_v62 = vshll.u32 %v70_v60, 26  ;;  %v73_v63 = vshrl.u32 %v70_v60, 6 }
  0x4a   :  { %v74_v0 = vor.u32 %v73_v63, %v72_v62 }
  0x4c   :  { %v75_v2 = vxor.u32 %v74_v0, %v71_v61 }
  0x4e   :  { %v76_v3 = vadd.s32 %v75_v2, %v71_v61  ;;  %v77_v4 = vshll.u32 %v75_v2, 6  ;;  %v78_v5 = vshrl.u32 %v75_v2, 26 }
  0x50   :  { %v79_v6 = vor.u32 %v78_v5, %v77_v4  ;;  %v81_v8 = vadd.s32 %v76_v3, %v455_v1 }
  0x52   :  { %v80_v7 = vxor.u32 %v79_v6, %v76_v3 }
  0x54   :  { %v82_v9 = vadd.s32 %v80_v7, %v455_v1 }
  0x56   :  { %v83_v10 = vadd.s32 3, %v82_v9 }
  0x58   :  { %v84_v11 = vadd.s32 %v83_v10, %v81_v8  ;;  %v85_v12 = vshll.u32 %v83_v10, 17  ;;  %v86_v13 = vshrl.u32 %v83_v10, 15 }
  0x5a   :  { %v87_v14 = vor.u32 %v86_v13, %v85_v12  ;;  %v433_v12 = vmov 683565275  }
  0x5c   :  { %v88_v15 = vxor.u32 %v87_v14, %v84_v11  ;;  %v434_v14 = vmov 2475754826  }
  0x5e   :  { %v89_v16 = vadd.s32 %v88_v15, %v84_v11  ;;  %v90_v17 = vshll.u32 %v88_v15, 29  ;;  %v91_v18 = vshrl.u32 %v88_v15, 3 }
  0x60   :  { %v92_v19 = vor.u32 %v91_v18, %v90_v17  ;;  %v435_v17 = vmov 2131351028  }
  0x62   :  { %v93_v20 = vxor.u32 %v92_v19, %v89_v16 }
  0x64   :  { %v94_v21 = vadd.s32 %v93_v20, %v89_v16  ;;  %v95_v23 = vshll.u32 %v93_v20, 16  ;;  %v96_v24 = vshrl.u32 %v93_v20, 16  ;;  %v436_v20 = vmov 2102212464  }
  0x66   :  { %v97_v25 = vor.u32 %v96_v24, %v95_v23  ;;  %v437_v24 = vmov 920167782  }
  0x68   :  { %v98_v26 = vxor.u32 %v97_v25, %v94_v21 }
  0x6a   :  { %v99_v27 = vadd.s32 %v98_v26, %v94_v21  ;;  %v100_v28 = vshll.u32 %v98_v26, 24  ;;  %v101_v29 = vshrl.u32 %v98_v26, 8 }
  0x6c   :  { %v102_v30 = vor.u32 %v101_v29, %v100_v28  ;;  %v104_v32 = vadd.s32 %v99_v27, %v455_v1 }
  0x6e   :  { %v103_v31 = vxor.u32 %v102_v30, %v99_v27  ;;  %v438_v27 = vmov 1326507024  }
  0x70   :  { %v105_v33 = vadd.s32 %v103_v31, %v460_v22 }
  0x72   :  { %v106_v34 = vadd.s32 4, %v105_v33 }
  0x74   :  { %v107_v35 = vadd.s32 %v106_v34, %v104_v32  ;;  %v108_v36 = vshll.u32 %v106_v34, 13  ;;  %v109_v37 = vshrl.u32 %v106_v34, 19 }
  0x76   :  { %v110_v38 = vor.u32 %v109_v37, %v108_v36 }
  0x78   :  { %v111_v39 = vxor.u32 %v110_v38, %v107_v35 }
  0x7a   :  { %v112_v40 = vadd.s32 %v111_v39, %v107_v35  ;;  %v113_v41 = vshll.u32 %v111_v39, 15  ;;  %v114_v42 = vshrl.u32 %v111_v39, 17 }
  0x7c   :  { %v115_v43 = vor.u32 %v114_v42, %v113_v41 }
  0x7e   :  { %v116_v44 = vxor.u32 %v115_v43, %v112_v40 }
  0x80   :  { %v117_v45 = vadd.s32 %v116_v44, %v112_v40  ;;  %v118_v46 = vshll.u32 %v116_v44, 26  ;;  %v119_v47 = vshrl.u32 %v116_v44, 6 }
  0x82   :  { %v120_v48 = vor.u32 %v119_v47, %v118_v46 }
  0x84   :  { %v121_v49 = vxor.u32 %v120_v48, %v117_v45 }
  0x86   :  { %v122_v50 = vadd.s32 %v121_v49, %v117_v45  ;;  %v123_v51 = vshll.u32 %v121_v49, 6  ;;  %v124_v52 = vshrl.u32 %v121_v49, 26 }
  0x88   :  { %v125_v53 = vor.u32 %v124_v52, %v123_v51  ;;  %v127_v55 = vadd.s32 %v122_v50, %v460_v22 }
  0x8a   :  { %v126_v54 = vxor.u32 %v125_v53, %v122_v50 }
  0x8c   :  { %v128_v56 = vadd.s32 %v126_v54, %v455_v1 }
  0x8e   :  { %v129_v57 = vadd.s32 5, %v128_v56 }
  0x90   :  { %v130_v58 = vxor.u32 %v129_v57, %v127_v55 }
  0x92   :  { %131 = set.rngseed %v130_v58 }
  0x93   :  { %v472_v59 = vrng }
  0x94   :  { %v133_v60 = vrng  ;;  %v134_v51 = vand.u32 8388607, %v472_v59 }
  0x95   :  { %v135_v61 = vand.u32 8388607, %v133_v60 }
  0x96   :  { %v136_v54 = vcvt.s32.f32 %v134_v51 }
  0x97   :  { %v137_v62 = vcvt.s32.f32 %v135_v61 }
  0x98   :  { %v138_v58 = vadd.f32 0.5, %v136_v54 }
  0x99   :  { %v140_v63 = vadd.f32 0.5, %v137_v62 }
  0x9a   :  { %v139_v62 = vmul.f32 1.1920929e-07, %v138_v58 }
  0x9b   :  { %v141_v0 = vmul.f32 1.1920929e-07, %v140_v63 }
  0x9c   :  { %401 = vlog2.f32 %v139_v62 }
  0x9d   :  { %v474_v2 = vmul.f32 6.2831855, %v141_v0 }
  0x9f   :  { %v156_v3 = vand.u32 2139095040, %v474_v2  ;;  %v153_v22 = vand.u32 2147483647, %v474_v2  ;;  %vm155_vm7 = vcmp.lt.s32.totalorder %v474_v2, 0 }
  0xa1   :  { %v157_v4 = vshrl.u32 %v156_v3, 23  ;;  %v160_v7 = vand.u32 8388607, %v153_v22  ;;  %vm154_vm8 = vcmp.le.f32.partialorder %v153_v22, 0.7853982 }
  0xa3   :  { %v380_v5 = vadd.s32 4294967169, %v157_v4  ;;  %v161_v10 = vor.u32 8388608, %v160_v7 }
  0xa5   :  { %v163_v6 = vadd.s32 1, %v380_v5  ;;  %v201_v34 = vshll.u32 %v161_v10, 8 }
  0xa7   :  { %vm164_vm0 = vcmp.gt.s32.totalorder %v163_v6, 0 }
  0xa8   :  { %v165_v1 = vsel %vm164_vm0, %v163_v6, 0 }
  0xa9   :  { %v167_v8 = vand.u32 31, %v165_v1  ;;  %v166_v11 = vshrl.u32 %v165_v1, 5  ;;  %v402_v1 = vpop.eup %401 }
  0xab   :  { %v168_v9 = vsub.s32 32, %v167_v8  ;;  %v170_v13 = vshll.u32 %v433_v12, %v167_v8  ;;  %v173_v15 = vshll.u32 %v434_v14, %v167_v8  ;;  %v176_v19 = vshll.u32 %v435_v17, %v167_v8 }
  0xac   :  { %v179_v23 = vshll.u32 %v436_v20, %v167_v8  ;;  %v182_v26 = vshll.u32 %v437_v24, %v167_v8  ;;  %vm185_vm1 = vcmp.lt.s32.totalorder %v166_v11, 1  ;;  %vm187_vm2 = vcmp.lt.s32.totalorder %v166_v11, 3 }
  0xad   :  { %v171_v16 = vshrl.u32 %v434_v14, %v168_v9  ;;  %v174_v18 = vshrl.u32 %v435_v17, %v168_v9  ;;  %v177_v21 = vshrl.u32 %v436_v20, %v168_v9  ;;  %v180_v25 = vshrl.u32 %v437_v24, %v168_v9 }
  0xae   :  { %v183_v28 = vshrl.u32 %v438_v27, %v168_v9  ;;  %vm188_vm3 = vcmp.lt.s32.totalorder %v166_v11, 4  ;;  %v169_v40 = vshrl.u32 %v433_v12, %v168_v9  ;;  %vm186_vm4 = vcmp.lt.s32.totalorder %v166_v11, 2 }
  0xaf   :  { %v172_v29 = vor.u32 %v171_v16, %v170_v13  ;;  %v175_v30 = vor.u32 %v174_v18, %v173_v15  ;;  %v178_v31 = vor.u32 %v177_v21, %v176_v19  ;;  %v181_v32 = vor.u32 %v180_v25, %v179_v23 }
  0xb0   :  { %v184_v33 = vor.u32 %v183_v28, %v182_v26  ;;  %v143_v13 = vmul.f32 0.6931472, %v402_v1 }
  0xb1   :  { %v193_v35 = vsel %vm185_vm1, %v172_v29, %v175_v30  ;;  %v197_v36 = vsel %vm185_vm1, %v175_v30, %v178_v31  ;;  %v190_v37 = vsel %vm188_vm3, %v178_v31, 2102212464  ;;  %v194_v38 = vsel %vm188_vm3, %v181_v32, 920167782 }
  0xb2   :  { %v198_v39 = vsel %vm188_vm3, %v184_v33, 1326507024  ;;  %v195_v41 = vsel %vm187_vm2, %v178_v31, %v194_v38  ;;  %v189_v45 = vsel %vm185_vm1, %v169_v40, %v172_v29  ;;  %v191_v46 = vsel %vm187_vm2, %v175_v30, %v190_v37 }
  0xb3   :  { %v199_v42 = vsel %vm187_vm2, %v181_v32, %v198_v39  ;;  %v196_v43 = vsel %vm186_vm4, %v193_v35, %v195_v41  ;;  %v192_v52 = vsel %vm186_vm4, %v189_v45, %v191_v46  ;;  %v144_v17 = vmul.f32 -2.0, %v143_v13 }
  0xb4   :  { %v200_v44 = vsel %vm186_vm4, %v197_v36, %v199_v42  ;;  %v483_v49 = vmul.u32.u64.low %v201_v34, %v196_v43  ;;  %v484_v50 = vmul.u32.u64.high %v201_v34, %v196_v43, %v483_v49  ;;  %v208_v55 = vmul.u32 %v201_v34, %v192_v52 }
  0xb5   :  { %v480_v47 = vmul.u32.u64.low %v201_v34, %v200_v44  ;;  %v481_v48 = vmul.u32.u64.high %v201_v34, %v200_v44, %v480_v47  ;;  %403 = vrsqrt.f32 %v144_v17  ;;  %vm147_vm9 = vcmp.eq.f32.partialorder %v144_v17, inf }
  0xb6   :  { %v211_v53 = vadd.s32 1, %v484_v50  ;;  %v150_v35 = vand.u32 2147483648, %v144_v17  ;;  %vm149_vm0 = vcmp.eq.f32.partialorder %v144_v17, 0.0  ;;  %vm245_vm1 = vweird.f32 %v474_v2 }
  0xb7   :  { %vm210_vm5 = vc.u32 %v481_v48, %v483_v49  ;;  %v209_v7 = vadd.s32 %v483_v49, %v481_v48 }
  0xb8   :  { %v212_v56 = vsel %vm210_vm5, %v211_v53, %v484_v50 }
  0xb9   :  { %v213_v57 = vadd.s32 %v212_v56, %v208_v55 }
  0xbb   :  { %v214_v60 = vadd.s32 536870912, %v213_v57 }
  0xbd   :  { %v215_v61 = vshrl.u32 %v214_v60, 30 }
  0xbf   :  { %v216_v63 = vshll.u32 %v215_v61, 30  ;;  %v239_v21 = vsub.s32 4, %v215_v61  ;;  %v404_v29 = vpop.eup %403 }
  0xc0   :  { %v146_v30 = vmul.f32 %v404_v29, %v144_v17 }
  0xc1   :  { %v217_v0 = vsub.s32 %v213_v57, %v216_v63  ;;  %v240_v25 = vsel %vm155_vm7, %v239_v21, %v215_v61 }
  0xc2   :  { %v242_v27 = vsel %vm154_vm8, 0, %v240_v25  ;;  %v148_v37 = vsel %vm147_vm9, %v144_v17, %v146_v30 }
  0xc3   :  { %v219_v3 = vsub.s32 0, %v217_v0  ;;  %v351_v28 = vadd.s32 3, %v242_v27  ;;  %v246_v31 = vand.u32 3, %v242_v27  ;;  %v151_v44 = vsel %vm149_vm0, %v150_v35, %v148_v37 }
  0xc5   :  { %v381_v4 = vmin.u32 %v219_v3, %v217_v0  ;;  %v352_v32 = vand.u32 3, %v351_v28  ;;  %vm251_vm10 = vcmp.eq.s32.totalorder %v246_v31, 2  ;;  %vm248_vm12 = vcmp.eq.s32.totalorder %v246_v31, 0 }
  0xc6   :  { %vm247_vm14 = vcmp.lt.s32.totalorder %v246_v31, 2 }
  0xc7   :  { %v221_v59 = vclz %v381_v4  ;;  %vm357_vm11 = vcmp.eq.s32.totalorder %v352_v32, 2  ;;  %vm354_vm13 = vcmp.eq.s32.totalorder %v352_v32, 0  ;;  %vm353_vm15 = vcmp.lt.s32.totalorder %v352_v32, 2 }
  0xc9   :  { %v382_v5 = vadd.s32 4294967294, %v221_v59 }
  0xcb   :  { %vm383_vm6 = vcmp.lt.s32.totalorder %v382_v5, 0 }
  0xcc   :  { %v224_v6 = vsel %vm383_vm6, 0, %v382_v5 }
  0xcd   :  { %v225_v8 = vsub.s32 32, %v224_v6  ;;  %v229_v9 = vsub.s32 4294967266, %v224_v6  ;;  %v226_v10 = vshll.u32 %v217_v0, %v224_v6 }
  0xcf   :  { %v227_v11 = vshrl.u32 %v209_v7, %v225_v8  ;;  %v230_v12 = vadd.s32 127, %v229_v9 }
  0xd1   :  { %v228_v14 = vor.u32 %v227_v11, %v226_v10  ;;  %v231_v15 = vshll.u32 %v230_v12, 23 }
  0xd3   :  { %v232_v16 = vor.u32 4788187, %v231_v15  ;;  %v235_v19 = vcvt.s32.f32 %v228_v14 }
  0xd5   :  { %v233_v18 = vand.u32 2147483647, %v232_v16 }
  0xd7   :  { %v236_v20 = vmul.f32 %v235_v19, %v233_v18 }
  0xd9   :  { %v237_v23 = vxor.u32 2147483648, %v236_v20 }
  0xdb   :  { %v238_v24 = vsel %vm155_vm7, %v237_v23, %v236_v20 }
  0xdc   :  { %v241_v26 = vsel %vm154_vm8, %v474_v2, %v238_v24 }
  0xdd   :  { %405 = vcosq.f32 %v241_v26 }
  0xde   :  { %407 = vsinq.f32 %v241_v26 }
  0xe7   :  { %v406_v33 = vpop.eup %405 }
  0xe8   :  { %v408_v34 = vpop.eup %407  ;;  %v252_v36 = vxor.u32 2147483648, %v406_v33 }
  0xe9   :  { %v249_v38 = vxor.u32 2147483648, %v408_v34 }
  0xea   :  { %v253_v22 = vsel %vm251_vm10, %v252_v36, %v408_v34  ;;  %v359_v39 = vsel %vm357_vm11, %v252_v36, %v408_v34 }
  0xeb   :  { %v250_v40 = vsel %vm248_vm12, %v406_v33, %v249_v38  ;;  %v356_v41 = vsel %vm354_vm13, %v406_v33, %v249_v38 }
  0xec   :  { %v254_v42 = vsel %vm247_vm14, %v250_v40, %v253_v22  ;;  %v360_v43 = vsel %vm353_vm15, %v356_v41, %v359_v39 }
  0xed   :  { %v255_v45 = vsel %vm245_vm1, nan, %v254_v42  ;;  %v361_v46 = vsel %vm245_vm1, nan, %v360_v43 }
  0xee   :  { %v256_v47 = vmul.f32 %v255_v45, %v151_v44  ;;  %v362_v48 = vmul.f32 %v361_v46, %v151_v44 }
  0xf0   :  { %257 = vst [vmem:[#allocation4] sm:$0xff] %v256_v47  ;;  %363 = vst [vmem:[#allocation4 + $0x8] sm:$0xff] %v362_v48 }
  0xf1   :  { %420 = shalt.err (!%p417_p4)
}
  0xf2   :  { %s421_s12 = scalar_lea.hbm %s509_s1, 256 }
  0xf3   :  { %p422_p5 = scmp.ne.s32.totalorder %s509_s1, %s421_s12  ;;  %p425_p6 = scmp.lt.u32.totalorder %s421_s12, %s509_s1 }
  0xf5   :  { %p427_p7 = pnand %p425_p6, %p422_p5 }
  0xf7   :  { %430 = shalt.err (!%p427_p7)
}
  0xf8   :  { %s440_s17 = smov 128   ;;  %s441_s18 = smov 8  }
  0xf9   :  { %375 = dma.vmem_to_hbm [thread:$0]  %s370_s8, 256, %s509_s1, [#allocation5], %s440_s17, %s440_s17, %s441_s18  }
  0xfa   :  { %431 = dma.done.wait [#allocation5], 256  }
  0xfb   :  { %432 = vsyncadd [#allocation5], 4294967040 }
  0xfc   :  { %379 = vsyncpa [#allocation5], 1 }

// kernel: fn.1
= control target key start
LH: loop header
LB: loop body
LE: loop exit
PB: predicated region body
PF: predicated region fallthrough
CT: control target
= control target key end

     0   :  { %v280_v25 = vmov 683565275   ;;  %v281_v27 = vmov 2475754826   ;;  %v282_v29 = vmov 2131351028   ;;  %s332_s0 = inlined_call_operand.vmem [shape: u32[16,128], index: 0, kind: input, shape index: {}]   ;;  %s333_s1 = inlined_call_operand.vmem [shape: f32[16,128], index: 1, kind: output, shape index: {}]  }
   0x1   :  { %v9_v0 = vld [vmem:[%s332_s0 + $0x8] sm:$0xff]  ;;  %v8_v13 = vld [vmem:[%s332_s0] sm:$0xff]  ;;  %v283_v37 = vmov 2102212464   ;;  %v284_v40 = vmov 920167782  }
   0x2   :  { %v11_v1 = vand.u32 8388607, %v9_v0  ;;  %v10_v16 = vand.u32 8388607, %v8_v13  ;;  %v285_v43 = vmov 1326507024  }
   0x4   :  { %v18_v2 = vshrl.u32 %v11_v1, 16  ;;  %v19_v3 = vand.u32 65535, %v11_v1  ;;  %v12_v19 = vshrl.u32 %v10_v16, 16  ;;  %v13_v31 = vand.u32 65535, %v10_v16 }
   0x6   :  { %v20_v4 = vcvt.s32.f32 %v18_v2  ;;  %v22_v5 = vcvt.s32.f32 %v19_v3  ;;  %v14_v32 = vcvt.s32.f32 %v12_v19  ;;  %v16_v56 = vcvt.s32.f32 %v13_v31 }
   0x8   :  { %v21_v6 = vmul.f32 65536.0, %v20_v4  ;;  %v15_v60 = vmul.f32 65536.0, %v14_v32 }
   0xa   :  { %v23_v7 = vadd.f32 %v22_v5, %v21_v6  ;;  %v17_v5 = vadd.f32 %v16_v56, %v15_v60 }
   0xc   :  { %v26_v8 = vadd.f32 0.5, %v23_v7 }
   0xe   :  { %v27_v9 = vmul.f32 1.1920929e-07, %v26_v8 }
  0x10   :  { %v299_v10 = vmul.f32 6.2831855, %v27_v9  ;;  %v24_v9 = vadd.f32 0.5, %v17_v5 }
  0x12   :  { %v42_v11 = vand.u32 2139095040, %v299_v10  ;;  %v39_v12 = vand.u32 2147483647, %v299_v10  ;;  %vm41_vm7 = vcmp.lt.s32.totalorder %v299_v10, 0 }
  0x14   :  { %v43_v14 = vshrl.u32 %v42_v11, 23  ;;  %v46_v17 = vand.u32 8388607, %v39_v12  ;;  %vm40_vm8 = vcmp.le.f32.partialorder %v39_v12, 0.7853982 }
  0x16   :  { %v254_v15 = vadd.s32 4294967169, %v43_v14  ;;  %v47_v20 = vor.u32 8388608, %v46_v17  ;;  %v25_v14 = vmul.f32 1.1920929e-07, %v24_v9 }
  0x18   :  { %v49_v18 = vadd.s32 1, %v254_v15  ;;  %v87_v33 = vshll.u32 %v47_v20, 8  ;;  %272 = vlog2.f32 %v25_v14 }
  0x1a   :  { %vm50_vm0 = vcmp.gt.s32.totalorder %v49_v18, 0 }
  0x1b   :  { %v51_v21 = vsel %vm50_vm0, %v49_v18, 0 }
  0x1c   :  { %v53_v22 = vand.u32 31, %v51_v21  ;;  %v52_v23 = vshrl.u32 %v51_v21, 5 }
  0x1e   :  { %v54_v24 = vsub.s32 32, %v53_v22  ;;  %v56_v26 = vshll.u32 %v280_v25, %v53_v22  ;;  %v59_v28 = vshll.u32 %v281_v27, %v53_v22  ;;  %v62_v30 = vshll.u32 %v282_v29, %v53_v22 }
  0x1f   :  { %v65_v39 = vshll.u32 %v283_v37, %v53_v22  ;;  %v68_v42 = vshll.u32 %v284_v40, %v53_v22  ;;  %vm71_vm1 = vcmp.lt.s32.totalorder %v52_v23, 1  ;;  %vm72_vm2 = vcmp.lt.s32.totalorder %v52_v23, 2 }
  0x20   :  { %v55_v34 = vshrl.u32 %v280_v25, %v54_v24  ;;  %v57_v35 = vshrl.u32 %v281_v27, %v54_v24  ;;  %v60_v36 = vshrl.u32 %v282_v29, %v54_v24  ;;  %v63_v38 = vshrl.u32 %v283_v37, %v54_v24 }
  0x21   :  { %v66_v41 = vshrl.u32 %v284_v40, %v54_v24  ;;  %v69_v44 = vshrl.u32 %v285_v43, %v54_v24  ;;  %vm73_vm3 = vcmp.lt.s32.totalorder %v52_v23, 3  ;;  %vm74_vm4 = vcmp.lt.s32.totalorder %v52_v23, 4 }
  0x22   :  { %v58_v45 = vor.u32 %v57_v35, %v56_v26  ;;  %v61_v46 = vor.u32 %v60_v36, %v59_v28  ;;  %v64_v47 = vor.u32 %v63_v38, %v62_v30  ;;  %v273_v22 = vpop.eup %272 }
  0x23   :  { %v67_v48 = vor.u32 %v66_v41, %v65_v39  ;;  %v70_v49 = vor.u32 %v69_v44, %v68_v42  ;;  %v29_v27 = vmul.f32 0.6931472, %v273_v22 }
  0x24   :  { %v75_v50 = vsel %vm71_vm1, %v55_v34, %v58_v45  ;;  %v79_v51 = vsel %vm71_vm1, %v58_v45, %v61_v46  ;;  %v83_v52 = vsel %vm71_vm1, %v61_v46, %v64_v47  ;;  %v76_v53 = vsel %vm74_vm4, %v64_v47, 2102212464 }
  0x25   :  { %v80_v54 = vsel %vm74_vm4, %v67_v48, 920167782  ;;  %v84_v55 = vsel %vm74_vm4, %v70_v49, 1326507024  ;;  %v77_v57 = vsel %vm73_vm3, %v61_v46, %v76_v53  ;;  %v30_v32 = vmul.f32 -2.0, %v29_v27 }
  0x26   :  { %v81_v58 = vsel %vm73_vm3, %v64_v47, %v80_v54  ;;  %v85_v59 = vsel %vm73_vm3, %v67_v48, %v84_v55  ;;  %v78_v61 = vsel %vm72_vm2, %v75_v50, %v77_v57  ;;  %vm131_vm1 = vweird.f32 %v299_v10 }
  0x27   :  { %v82_v62 = vsel %vm72_vm2, %v79_v51, %v81_v58  ;;  %v86_v63 = vsel %vm72_vm2, %v83_v52, %v85_v59  ;;  %v94_v4 = vmul.u32 %v87_v33, %v78_v61  ;;  %274 = vrsqrt.f32 %v30_v32 }
  0x28   :  { %v311_v0 = vmul.u32.u64.low %v87_v33, %v86_v63  ;;  %v312_v1 = vmul.u32.u64.high %v87_v33, %v86_v63, %v311_v0  ;;  %v314_v2 = vmul.u32.u64.low %v87_v33, %v82_v62  ;;  %v315_v3 = vmul.u32.u64.high %v87_v33, %v82_v62, %v314_v2 }
  0x29   :  { %vm33_vm9 = vcmp.eq.f32.partialorder %v30_v32, inf  ;;  %vm35_vm10 = vcmp.eq.f32.partialorder %v30_v32, 0.0  ;;  %v36_v49 = vand.u32 2147483648, %v30_v32 }
  0x2a   :  { %vm96_vm5 = vc.u32 %v312_v1, %v314_v2  ;;  %v97_v6 = vadd.s32 1, %v315_v3  ;;  %v95_v21 = vadd.s32 %v314_v2, %v312_v1 }
  0x2c   :  { %v98_v7 = vsel %vm96_vm5, %v97_v6, %v315_v3 }
  0x2d   :  { %v99_v8 = vadd.s32 %v98_v7, %v94_v4 }
  0x2f   :  { %v100_v11 = vadd.s32 536870912, %v99_v8 }
  0x31   :  { %v101_v13 = vshrl.u32 %v100_v11, 30  ;;  %v275_v44 = vpop.eup %274 }
  0x32   :  { %v32_v47 = vmul.f32 %v275_v44, %v30_v32 }
  0x33   :  { %v102_v15 = vshll.u32 %v101_v13, 30  ;;  %v125_v36 = vsub.s32 4, %v101_v13 }
  0x34   :  { %v34_v50 = vsel %vm33_vm9, %v30_v32, %v32_v47 }
  0x35   :  { %v103_v16 = vsub.s32 %v99_v8, %v102_v15  ;;  %v126_v39 = vsel %vm41_vm7, %v125_v36, %v101_v13  ;;  %v37_v55 = vsel %vm35_vm10, %v36_v49, %v34_v50 }
  0x36   :  { %v128_v42 = vsel %vm40_vm8, 0, %v126_v39 }
  0x37   :  { %v105_v17 = vsub.s32 0, %v103_v16  ;;  %v237_v43 = vadd.s32 3, %v128_v42  ;;  %v132_v45 = vand.u32 3, %v128_v42 }
  0x39   :  { %v255_v18 = vmin.u32 %v105_v17, %v103_v16  ;;  %v238_v46 = vand.u32 3, %v237_v43  ;;  %vm137_vm11 = vcmp.eq.s32.totalorder %v132_v45, 2  ;;  %vm134_vm13 = vcmp.eq.s32.totalorder %v132_v45, 0 }
  0x3a   :  { %vm133_vm15 = vcmp.lt.s32.totalorder %v132_v45, 2 }
  0x3b   :  { %v107_v19 = vclz %v255_v18  ;;  %vm243_vm12 = vcmp.eq.s32.totalorder %v238_v46, 2  ;;  %vm240_vm14 = vcmp.eq.s32.totalorder %v238_v46, 0  ;;  %vm239_vm0 = vcmp.lt.s32.totalorder %v238_v46, 2 }
  0x3d   :  { %v256_v20 = vadd.s32 4294967294, %v107_v19 }
  0x3f   :  { %vm257_vm6 = vcmp.lt.s32.totalorder %v256_v20, 0 }
  0x40   :  { %v110_v23 = vsel %vm257_vm6, 0, %v256_v20 }
  0x41   :  { %v111_v24 = vsub.s32 32, %v110_v23  ;;  %v112_v25 = vshll.u32 %v103_v16, %v110_v23  ;;  %v115_v26 = vsub.s32 4294967266, %v110_v23 }
  0x43   :  { %v113_v28 = vshrl.u32 %v95_v21, %v111_v24  ;;  %v116_v29 = vadd.s32 127, %v115_v26 }
  0x45   :  { %v114_v30 = vor.u32 %v113_v28, %v112_v25  ;;  %v117_v31 = vshll.u32 %v116_v29, 23 }
  0x47   :  { %v118_v33 = vor.u32 4788187, %v117_v31  ;;  %v121_v34 = vcvt.s32.f32 %v114_v30 }
  0x49   :  { %v119_v35 = vand.u32 2147483647, %v118_v33 }
  0x4b   :  { %v122_v37 = vmul.f32 %v121_v34, %v119_v35 }
  0x4d   :  { %v123_v38 = vxor.u32 2147483648, %v122_v37 }
  0x4f   :  { %v124_v40 = vsel %vm41_vm7, %v123_v38, %v122_v37 }
  0x50   :  { %v127_v41 = vsel %vm40_vm8, %v299_v10, %v124_v40 }
  0x51   :  { %276 = vcosq.f32 %v127_v41 }
  0x52   :  { %278 = vsinq.f32 %v127_v41 }
  0x5b   :  { %v277_v48 = vpop.eup %276 }
  0x5c   :  { %v279_v12 = vpop.eup %278  ;;  %v138_v51 = vxor.u32 2147483648, %v277_v48 }
  0x5d   :  { %v135_v52 = vxor.u32 2147483648, %v279_v12 }
  0x5e   :  { %v139_v53 = vsel %vm137_vm11, %v138_v51, %v279_v12  ;;  %v245_v54 = vsel %vm243_vm12, %v138_v51, %v279_v12 }
  0x5f   :  { %v136_v56 = vsel %vm134_vm13, %v277_v48, %v135_v52  ;;  %v242_v57 = vsel %vm240_vm14, %v277_v48, %v135_v52 }
  0x60   :  { %v140_v58 = vsel %vm133_vm15, %v136_v56, %v139_v53  ;;  %v246_v59 = vsel %vm239_vm0, %v242_v57, %v245_v54 }
  0x61   :  { %v141_v60 = vsel %vm131_vm1, nan, %v140_v58  ;;  %v247_v61 = vsel %vm131_vm1, nan, %v246_v59 }
  0x62   :  { %v142_v62 = vmul.f32 %v141_v60, %v37_v55  ;;  %v248_v63 = vmul.f32 %v247_v61, %v37_v55 }
  0x64   :  { %143 = vst [vmem:[%s333_s1] sm:$0xff] %v142_v62  ;;  %249 = vst [vmem:[%s333_s1 + $0x8] sm:$0xff] %v248_v63 }

</bundles_post_ra>
